<compile_context>
chip_gen: v5e
topology: v5e:2x2
jax: 0.10.0
libtpu: 0.0.40
codegen_flags: <defaults>
</compile_context>

<pallas_src>
import functools

import jax
import jax.numpy as jnp
from jax.experimental import pallas as pl
from jax.experimental.pallas import tpu as pltpu

LANE = 128          # vreg lane width
SUBLANE_BF16 = 16   # bf16 sublane packing (one bf16 vreg holds [16, 128])


def _round_up(n, m):
    return ((n + m - 1) // m) * m


def _cdiv(a, b):
    return (a + b - 1) // b


def _is_multi_tensorcore():
    # v7x has 2 TensorCores per chip; v5e/v6e have 1.
    try:
        return "v7" in jax.devices()[0].device_kind.lower()
    except Exception:
        return False


def _default_batch_tile(B):
    # Balanced tiles capped at ~512 rows (so B=600 -> 2 x 304, not 2 x 512).
    n_tiles = max(1, _cdiv(B, 512))
    # On v7x force >= 2 grid steps so ("parallel",) shards across both TensorCores.
    if _is_multi_tensorcore() and B > 2 * SUBLANE_BF16:
        n_tiles = max(n_tiles, 2)
    return _round_up(_cdiv(B, n_tiles), SUBLANE_BF16)


def _ac_kernel(num_trunk, out_pads, *refs):
    """refs = (x_ref, W1, ..., Wt, W_heads, bias_stack, out_ref).

    Trunk layers get a Tanh; the fused (actor|critic) head layer does not.
    Matmuls run on the MXU in bf16 with f32 accumulation; bias-add / tanh in f32.
    """
    x_ref = refs[0]
    w_refs = refs[1:2 + num_trunk]
    b_ref = refs[-2]            # (num_layers, max_out_pad) f32, stacked biases
    out_ref = refs[-1]

    h = x_ref[...]              # bf16, goes straight into the MXU
    for i in range(num_trunk + 1):
        w = w_refs[i][...]                              # (in_pad_i, out_pad_i) bf16
        b = b_ref[i:i + 1, :out_pads[i]]                # (1, out_pad_i) f32
        acc = jnp.dot(h, w, preferred_element_type=jnp.float32) + b
        if i < num_trunk:
            h = jnp.tanh(acc).astype(w.dtype)           # tanh f32 (v5e-safe), bf16 to MXU
        else:
            out_ref[...] = acc.astype(out_ref.dtype)


def init_actor_critic_params(key, input_dim, hidden_layers, output_dim):
    """PyTorch nn.Linear default init (U(-1/sqrt(fan_in), +)), weights stored (in, out)."""
    def linear(k, fan_in, fan_out):
        kw, kb = jax.random.split(k)
        bound = 1.0 / jnp.sqrt(fan_in)
        w = jax.random.uniform(kw, (fan_in, fan_out), jnp.float32, -bound, bound)
        b = jax.random.uniform(kb, (fan_out,), jnp.float32, -bound, bound)
        return w, b

    dims = [input_dim] + list(hidden_layers)
    keys = jax.random.split(key, len(hidden_layers) + 2)
    trunk = [linear(keys[i], dims[i], dims[i + 1]) for i in range(len(hidden_layers))]
    actor = linear(keys[-2], hidden_layers[-1], output_dim)
    critic = linear(keys[-1], hidden_layers[-1], 1)
    return {"trunk": trunk, "actor": actor, "critic": critic}


def pack_params(params, *, weight_dtype=jnp.bfloat16):
    """Fuse actor/critic heads, lane-pad only output dims, stack biases, cast to bf16.

    Zero-padding is exact: padded weight rows/cols and bias entries are 0 and
    tanh(0) == 0, so padded lanes carry exact zeros through the whole trunk.
    """
    wa, ba = params["actor"]
    wc, bc = params["critic"]
    w_head = jnp.concatenate([wa, wc], axis=1)          # (hidden_last, output_dim + 1)
    b_head = jnp.concatenate([ba, bc], axis=0)
    layers = list(params["trunk"]) + [(w_head, b_head)]

    din = layers[0][0].shape[0]
    din_pad = _round_up(din, SUBLANE_BF16)              # NOT 128: only bf16 sublane packing
    out_pads = [_round_up(w.shape[1], LANE) for (w, _) in layers]
    in_pads = [din_pad] + out_pads[:-1]                 # layer i+1 input = layer i output

    weights = []
    for (w, _), ip, op in zip(layers, in_pads, out_pads):
        w_p = jnp.zeros((ip, op), jnp.float32).at[:w.shape[0], :w.shape[1]].set(w)
        weights.append(w_p.astype(weight_dtype))

    max_op = max(out_pads)
    bias = jnp.zeros((len(layers), max_op), jnp.float32)
    for i, (_, b) in enumerate(layers):
        bias = bias.at[i, :b.shape[0]].set(b)           # biases stay f32

    return {"weights": weights, "bias": bias, "out_pads": tuple(out_pads),
            "din": din, "din_pad": din_pad}


def actor_critic_forward(x, packed, output_dim, *, batch_tile=None):
    """x: (B, input_dim) f32. Returns (actor (B, output_dim), critic (B, 1)) in f32."""
    weights = packed["weights"]
    bias = packed["bias"]
    out_pads = packed["out_pads"]
    din, din_pad = packed["din"], packed["din_pad"]
    num_trunk = len(weights) - 1
    out_pad = out_pads[-1]

    B = x.shape[0]
    if batch_tile is None:
        batch_tile = _default_batch_tile(B)
    batch_tile = _round_up(batch_tile, SUBLANE_BF16)
    B_pad = _round_up(B, batch_tile)

    # Feed x to the MXU as bf16 (halves DMA bytes, no in-kernel cast). Only pad when
    # actually needed (ragged batch / non-16-multiple input dim); pad+cast is one pass.
    if B_pad == B and din_pad == din:
        x_in = x.astype(jnp.bfloat16)
    else:
        x_in = jnp.zeros((B_pad, din_pad), jnp.bfloat16).at[:B, :din].set(
            x.astype(jnp.bfloat16))

    in_specs = [pl.BlockSpec((batch_tile, din_pad), lambda i: (i, 0))]
    for w in weights:
        # Full-extent block + constant index_map -> weight stays resident in VMEM
        # across grid steps.  TODO(synk): at 2048-4096 hidden widths add
        # pipeline_mode=pl.Buffered(1) here and raise vmem_limit_bytes (v7x: 64 MiB VMEM).
        in_specs.append(pl.BlockSpec(w.shape, lambda i: (0, 0)))
    in_specs.append(pl.BlockSpec(bias.shape, lambda i: (0, 0)))   # single stacked bias DMA

    kernel = functools.partial(_ac_kernel, num_trunk, out_pads)

    out = pl.pallas_call(
        kernel,
        out_shape=jax.ShapeDtypeStruct((B_pad, out_pad), jnp.float32),
        grid_spec=pltpu.PrefetchScalarGridSpec(
            num_scalar_prefetch=0,
            grid=(B_pad // batch_tile,),
            in_specs=in_specs,
            out_specs=pl.BlockSpec((batch_tile, out_pad), lambda i: (i, 0)),
        ),
        compiler_params=pltpu.CompilerParams(
            dimension_semantics=("parallel",)),
    )(x_in, *weights, bias)

    actor = out[:B, :output_dim]
    critic = out[:B, output_dim:output_dim + 1]
    return actor, critic


def reference_forward(x, params, *, weight_dtype=jnp.bfloat16):
    """Pure-JAX reference with the same bf16 operand rounding / f32 accumulation."""
    def mm(a, w):
        a_r = a.astype(weight_dtype).astype(jnp.float32)
        w_r = w.astype(weight_dtype).astype(jnp.float32)
        return jnp.dot(a_r, w_r, precision=jax.lax.Precision.HIGHEST)

    h = x
    for (w, b) in params["trunk"]:
        h = jnp.tanh(mm(h, w) + b[None, :])
    wa, ba = params["actor"]
    wc, bc = params["critic"]
    actor = mm(h, wa) + ba[None, :]
    critic = mm(h, wc) + bc[None, :]
    return actor, critic


if __name__ == "__main__":
    key = jax.random.PRNGKey(0)
    k_x, k_p = jax.random.split(key)

    # Small shapes consistent with ActorCriticPolicy(input_dim, hidden_layers, output_dim)
    batch, input_dim, hidden_layers, output_dim = 16, 32, [64, 32], 8

    x = jax.random.normal(k_x, (batch, input_dim), jnp.float32)
    params = init_actor_critic_params(k_p, input_dim, hidden_layers, output_dim)
    packed = pack_params(params)

    actor, critic = actor_critic_forward(x, packed, output_dim)
    actor, critic = jax.block_until_ready((actor, critic))

    ref_actor, ref_critic = reference_forward(x, params)
    assert actor.shape == (batch, output_dim)
    assert critic.shape == (batch, 1)
    assert jnp.allclose(actor, ref_actor, atol=1e-4, rtol=1e-4), "actor mismatch"
    assert jnp.allclose(critic, ref_critic, atol=1e-4, rtol=1e-4), "critic mismatch"

    # Also exercise a ragged / larger batch to cover the multi-step, padded path.
    x2 = jax.random.normal(k_x, (37, input_dim), jnp.float32)
    a2, c2 = jax.block_until_ready(actor_critic_forward(x2, packed, output_dim))
    ra2, rc2 = reference_forward(x2, params)
    assert a2.shape == (37, output_dim) and c2.shape == (37, 1)
    assert jnp.allclose(a2, ra2, atol=1e-4, rtol=1e-4), "actor mismatch (ragged)"
    assert jnp.allclose(c2, rc2, atol=1e-4, rtol=1e-4), "critic mismatch (ragged)"

    # TODO(synk): actor_to_distribution()/act() (Categorical softmax, argmax, sampling)
    # is inference-time glue, done with jax.nn.softmax / jnp.argmax / jax.random.categorical
    # on the actor logits outside the kernel.
    print("KERNEL_OK")
</pallas_src>

<mosaic_0001>
module attributes {stable_mosaic.version = 11 : i64} {
  func.func @_ac_kernel(%arg0: i32, %arg1: memref<16x32xbf16, #tpu.memory_space<vmem>>, %arg2: memref<32x128xbf16, #tpu.memory_space<vmem>>, %arg3: memref<128x128xbf16, #tpu.memory_space<vmem>>, %arg4: memref<128x128xbf16, #tpu.memory_space<vmem>>, %arg5: memref<3x128xf32, #tpu.memory_space<vmem>>, %arg6: memref<16x128xf32, #tpu.memory_space<vmem>>) attributes {dimension_semantics = [#tpu.dimension_semantics<parallel>], iteration_bounds = array<i64: 1>, scalar_prefetch = 0 : i64, scratch_operands = 0 : i64, tpu.core_type = #tpu.core_type<tc>, window_params = [{transform_indices = @transform_0, window_bounds = array<i64: 16, 32>}, {pipeline_mode = #tpu.pipeline_mode<synchronous>, transform_indices = @transform_1, window_bounds = array<i64: 32, 128>}, {pipeline_mode = #tpu.pipeline_mode<synchronous>, transform_indices = @transform_2, window_bounds = array<i64: 128, 128>}, {pipeline_mode = #tpu.pipeline_mode<synchronous>, transform_indices = @transform_3, window_bounds = array<i64: 128, 128>}, {pipeline_mode = #tpu.pipeline_mode<synchronous>, transform_indices = @transform_4, window_bounds = array<i64: 3, 128>}, {transform_indices = @transform_5, window_bounds = array<i64: 16, 128>}]} {
    %c0 = arith.constant 0 : index
    %c0_0 = arith.constant 0 : index
    %0 = vector.load %arg1[%c0, %c0_0] : memref<16x32xbf16, #tpu.memory_space<vmem>>, vector<16x32xbf16>
    %c0_1 = arith.constant 0 : index
    %c0_2 = arith.constant 0 : index
    %1 = vector.load %arg2[%c0_1, %c0_2] : memref<32x128xbf16, #tpu.memory_space<vmem>>, vector<32x128xbf16>
    %c0_3 = arith.constant 0 : index
    %c0_4 = arith.constant 0 : index
    %2 = vector.load %arg5[%c0_3, %c0_4] : memref<3x128xf32, #tpu.memory_space<vmem>>, vector<1x128xf32>
    %cst = arith.constant dense<0.000000e+00> : vector<16x128xf32>
    %3 = tpu.matmul %0, %1, %cst {dimension_numbers = #tpu.dot_dimension_numbers<[1], [0], [0], [1], [0, 0, 1, 1], [], []>} : vector<16x32xbf16>, vector<32x128xbf16>, vector<16x128xf32> -> vector<16x128xf32>
    %4 = vector.broadcast %2 : vector<1x128xf32> to vector<16x128xf32>
    %5 = arith.addf %3, %4 : vector<16x128xf32>
    %6 = math.tanh %5 : vector<16x128xf32>
    %7 = arith.truncf %6 : vector<16x128xf32> to vector<16x128xbf16>
    %c0_5 = arith.constant 0 : index
    %c0_6 = arith.constant 0 : index
    %8 = vector.load %arg3[%c0_5, %c0_6] : memref<128x128xbf16, #tpu.memory_space<vmem>>, vector<128x128xbf16>
    %c1 = arith.constant 1 : index
    %c0_7 = arith.constant 0 : index
    %9 = vector.load %arg5[%c1, %c0_7] : memref<3x128xf32, #tpu.memory_space<vmem>>, vector<1x128xf32>
    %cst_8 = arith.constant dense<0.000000e+00> : vector<16x128xf32>
    %10 = tpu.matmul %7, %8, %cst_8 {dimension_numbers = #tpu.dot_dimension_numbers<[1], [0], [0], [1], [0, 0, 1, 1], [], []>} : vector<16x128xbf16>, vector<128x128xbf16>, vector<16x128xf32> -> vector<16x128xf32>
    %11 = vector.broadcast %9 : vector<1x128xf32> to vector<16x128xf32>
    %12 = arith.addf %10, %11 : vector<16x128xf32>
    %13 = math.tanh %12 : vector<16x128xf32>
    %14 = arith.truncf %13 : vector<16x128xf32> to vector<16x128xbf16>
    %c0_9 = arith.constant 0 : index
    %c0_10 = arith.constant 0 : index
    %15 = vector.load %arg4[%c0_9, %c0_10] : memref<128x128xbf16, #tpu.memory_space<vmem>>, vector<128x128xbf16>
    %c2 = arith.constant 2 : index
    %c0_11 = arith.constant 0 : index
    %16 = vector.load %arg5[%c2, %c0_11] : memref<3x128xf32, #tpu.memory_space<vmem>>, vector<1x128xf32>
    %cst_12 = arith.constant dense<0.000000e+00> : vector<16x128xf32>
    %17 = tpu.matmul %14, %15, %cst_12 {dimension_numbers = #tpu.dot_dimension_numbers<[1], [0], [0], [1], [0, 0, 1, 1], [], []>} : vector<16x128xbf16>, vector<128x128xbf16>, vector<16x128xf32> -> vector<16x128xf32>
    %18 = vector.broadcast %16 : vector<1x128xf32> to vector<16x128xf32>
    %19 = arith.addf %17, %18 : vector<16x128xf32>
    %c0_13 = arith.constant 0 : index
    %c0_14 = arith.constant 0 : index
    %20 = vector.load %arg6[%c0_13, %c0_14] : memref<16x128xf32, #tpu.memory_space<vmem>>, vector<16x128xf32>
    tpu.vector_store %arg6[%c0_13, %c0_14], %19 {strides = array<i32>} : memref<16x128xf32, #tpu.memory_space<vmem>>, vector<16x128xf32>,
    return
  }
  func.func @transform_0(%arg0: i32) -> (i32, i32) {
    %c0_i32 = arith.constant 0 : i32
    %c0_i32_0 = arith.constant 0 : i32
    return %arg0, %c0_i32 : i32, i32
  }
  func.func @transform_1(%arg0: i32) -> (i32, i32) {
    %c0_i32 = arith.constant 0 : i32
    %c0_i32_0 = arith.constant 0 : i32
    %c0_i32_1 = arith.constant 0 : i32
    return %c0_i32, %c0_i32_0 : i32, i32
  }
  func.func @transform_2(%arg0: i32) -> (i32, i32) {
    %c0_i32 = arith.constant 0 : i32
    %c0_i32_0 = arith.constant 0 : i32
    %c0_i32_1 = arith.constant 0 : i32
    return %c0_i32, %c0_i32_0 : i32, i32
  }
  func.func @transform_3(%arg0: i32) -> (i32, i32) {
    %c0_i32 = arith.constant 0 : i32
    %c0_i32_0 = arith.constant 0 : i32
    %c0_i32_1 = arith.constant 0 : i32
    return %c0_i32, %c0_i32_0 : i32, i32
  }
  func.func @transform_4(%arg0: i32) -> (i32, i32) {
    %c0_i32 = arith.constant 0 : i32
    %c0_i32_0 = arith.constant 0 : i32
    %c0_i32_1 = arith.constant 0 : i32
    return %c0_i32, %c0_i32_0 : i32, i32
  }
  func.func @transform_5(%arg0: i32) -> (i32, i32) {
    %c0_i32 = arith.constant 0 : i32
    %c0_i32_0 = arith.constant 0 : i32
    return %arg0, %c0_i32 : i32, i32
  }
}

</mosaic_0001>

<bundles_post_ra>
// kernel: tpu_custom_call.1
= control target key start
LH: loop header
LB: loop body
LE: loop exit
PB: predicated region body
PF: predicated region fallthrough
CT: control target
= control target key end

     0   :  { %10 = vsyncpa [#allocation3], 0  ;;  %s657_s0 = inlined_call_operand.hbm [shape: bf16[16,32], index: 0, kind: input, shape index: {}]   ;;  %s658_s1 = inlined_call_operand.hbm [shape: bf16[32,128], index: 1, kind: input, shape index: {}]   ;;  %s659_s2 = inlined_call_operand.hbm [shape: bf16[128,128], index: 2, kind: input, shape index: {}]   ;;  %s660_s3 = inlined_call_operand.hbm [shape: bf16[128,128], index: 3, kind: input, shape index: {}]   ;;  %s661_s4 = inlined_call_operand.hbm [shape: f32[3,128], index: 4, kind: input, shape index: {}]   ;;  %s662_s5 = inlined_call_operand.hbm [shape: f32[16,128], index: 5, kind: output, shape index: {}]  }
   0x1   :  { %11 = vsyncpa [#allocation6], 0 }
   0x2   :  { %12 = vsyncpa [#allocation9], 0 }
   0x3   :  { %13 = vsyncpa [#allocation4], 0  ;;  %s31_s20 = sshll.u32 %s658_s1, 4  ;;  %s599_s21 = smov [#allocation5]   ;;  %s32_s20 = int_to_ptr.hbm [resolvable:$true] %s31_s20 }
   0x4   :  { %s33_s22 = sshll.u32 %s599_s21, 4  ;;  %s57_s25 = sshll.u32 %s660_s3, 4  ;;  %s34_s22 = int_to_ptr.vmem [resolvable:$true] %s33_s22  ;;  %s58_s25 = int_to_ptr.hbm [resolvable:$true] %s57_s25 }
   0x5   :  { %s600_s26 = smov 64   ;;  %s601_s27 = smov 4  }
   0x6   :  { %39 = dma.hbm_to_vmem [thread:$0]  %s32_s20, 256, %s34_s22, [#allocation6], %s600_s26, %s600_s26, %s601_s27  }
   0x7   :  { %s602_s28 = smov [#allocation8]   ;;  %s18_s7 = sshll.u32 %s657_s0, 4  ;;  %s19_s7 = int_to_ptr.hbm [resolvable:$true] %s18_s7 }
   0x8   :  { %s59_s29 = sshll.u32 %s602_s28, 4  ;;  %s44_s9 = sshll.u32 %s659_s2, 4  ;;  %s60_s29 = int_to_ptr.vmem [resolvable:$true] %s59_s29  ;;  %s45_s9 = int_to_ptr.hbm [resolvable:$true] %s44_s9 }
   0x9   :  { %65 = dma.hbm_to_vmem [thread:$0]  %s58_s25, 1024, %s60_s29, [#allocation9], %s600_s26, %s600_s26, %s601_s27  }
   0xa   :  { %s603_s10 = smov [#allocation2]   ;;  %s604_s3 = smov [#allocation7]  }
   0xb   :  { %s20_s11 = sshll.u32 %s603_s10, 4  ;;  %s46_s12 = sshll.u32 %s604_s3, 4  ;;  %s21_s11 = int_to_ptr.vmem [resolvable:$true] %s20_s11  ;;  %s47_s12 = int_to_ptr.vmem [resolvable:$true] %s46_s12 }
   0xc   :  { %26 = dma.hbm_to_vmem [thread:$0]  %s19_s7, 128, %s21_s11, [#allocation3], %s600_s26, %s600_s26, %s601_s27  }
   0xd   :  { %s71_s15 = sshll.u32 %s661_s4, 4  ;;  %s605_s0 = smov [#allocation10]   ;;  %s72_s15 = int_to_ptr.hbm [resolvable:$true] %s71_s15 }
   0xe   :  { %52 = dma.hbm_to_vmem [thread:$0]  %s45_s9, 1024, %s47_s12, [#allocation6], %s600_s26, %s600_s26, %s601_s27  }
   0xf   :  { %s73_s16 = sshll.u32 %s605_s0, 4  ;;  %s74_s16 = int_to_ptr.vmem [resolvable:$true] %s73_s16 }
  0x10   :  { %76 = dma.hbm_to_vmem [thread:$0]  %s72_s15, 64, %s74_s16, [#allocation9]  }
  0x11   :  { %591 = dma.done.wait [#allocation3], 128  }
  0x12   :  { %592 = vsyncadd [#allocation3], 4294967168 }
  0x13   :  { %593 = dma.done.wait [#allocation6], 1280  }
  0x14   :  { %594 = vsyncadd [#allocation6], 4294966016 }
  0x15   :  { %595 = dma.done.wait [#allocation9], 1088  }
  0x16   :  { %596 = vsyncadd [#allocation9], 4294966208  ;;  %v409_v0 = vld [vmem:[#allocation5 + $0x8] sm:$0xff]  ;;  %v408_v2 = vld [vmem:[#allocation5] sm:$0xff]  ;;  %vm123_vm0 = vcmask 261120   ;;  %s606_s2 = smov [#allocation11]  }
  0x17   :  { %v417_v1 = vld [vmem:[#allocation7 + $0x38] sm:$0xff]  ;;  %133 = vmatpush.bf16.msra.mxu0 %v409_v0  ;;  %v416_v3 = vld [vmem:[#allocation7 + $0x30] sm:$0xff]  ;;  %v407_v4 = vld [vmem:[#allocation2] sm:$0xff]  ;;  %s313_s4 = sshll.u32 %s606_s2, 4  ;;  %s315_s19 = sshll.u32 %s662_s5, 4  ;;  %s314_s4 = int_to_ptr.vmem [resolvable:$true] %s313_s4  ;;  %s316_s19 = int_to_ptr.hbm [resolvable:$true] %s315_s19 }
  0x18   :  { %210 = vmatpush.bf16.msra.mxu1 %v417_v1  ;;  %v415_v5 = vld [vmem:[#allocation7 + $0x28] sm:$0xff]  ;;  %v414_v6 = vld [vmem:[#allocation7 + $0x20] sm:$0xff]  ;;  %v413_v7 = vld [vmem:[#allocation7 + $0x18] sm:$0xff]  ;;  %s607_s20 = smov 128   ;;  %s608_s21 = smov 8  }
  0x19   :  { %v412_v8 = vld [vmem:[#allocation7 + $0x10] sm:$0xff]  ;;  %v411_v9 = vld [vmem:[#allocation7 + $0x8] sm:$0xff]  ;;  %v410_v10 = vld [vmem:[#allocation7] sm:$0xff] }
  0x1a   :  { %v425_v11 = vld [vmem:[#allocation8 + $0x38] sm:$0xff]  ;;  %v424_v12 = vld [vmem:[#allocation8 + $0x30] sm:$0xff]  ;;  %v423_v13 = vld [vmem:[#allocation8 + $0x28] sm:$0xff] }
  0x1b   :  { %134 = vmatpush.bf16.msra.mxu0 %v408_v2  ;;  %293 = vmatpush.bf16.msra.mxu2 %v425_v11  ;;  %v436_v15 = vld [vmem:[#allocation10] ss:$0 sm:$0xff]  ;;  %v421_v23 = vld [vmem:[#allocation8 + $0x18] sm:$0xff]  ;;  %v420_v24 = vld [vmem:[#allocation8 + $0x10] sm:$0xff] }
  0x1c   :  { %211 = vmatpush.bf16.msra.mxu1 %v416_v3  ;;  %v422_v22 = vld [vmem:[#allocation8 + $0x20] sm:$0xff]  ;;  %v419_v25 = vld [vmem:[#allocation8 + $0x8] sm:$0xff] }
  0x1d   :  { %v418_v26 = vld [vmem:[#allocation8] sm:$0xff] }
  0x1e   :  { %342 = vmatmul.msk.bf16.vlgmr.msra.gmra.mxu0 %vm123_vm0, %v407_v4  ;;  %v437_v28 = vld [vmem:[#allocation10 + $0x1] ss:$0 sm:$0xff]  ;;  %v438_v35 = vld [vmem:[#allocation10 + $0x2] ss:$0 sm:$0xff] }
  0x1f   :  { %294 = vmatpush.bf16.msra.mxu2 %v424_v12 }
  0x20   :  { %212 = vmatpush.bf16.msra.mxu1 %v415_v5 }
  0x23   :  { %295 = vmatpush.bf16.msra.mxu2 %v423_v13 }
  0x24   :  { %213 = vmatpush.bf16.msra.mxu1 %v414_v6 }
  0x27   :  { %296 = vmatpush.bf16.msra.mxu2 %v422_v22 }
  0x28   :  { %214 = vmatpush.bf16.msra.mxu1 %v413_v7 }
  0x2b   :  { %297 = vmatpush.bf16.msra.mxu2 %v421_v23 }
  0x2c   :  { %215 = vmatpush.bf16.msra.mxu1 %v412_v8 }
  0x2f   :  { %298 = vmatpush.bf16.msra.mxu2 %v420_v24 }
  0x30   :  { %216 = vmatpush.bf16.msra.mxu1 %v411_v9 }
  0x33   :  { %299 = vmatpush.bf16.msra.mxu2 %v419_v25 }
  0x34   :  { %217 = vmatpush.bf16.msra.mxu1 %v410_v10 }
  0x37   :  { %300 = vmatpush.bf16.msra.mxu2 %v418_v26 }
  0x9b   :  { %v136_v14 = vpop.f32.mrf.mxu0 }
  0x9c   :  { %v137_v16 = vadd.f32 %v436_v15, %v136_v14 }
  0x9e   :  { %439 = vtanh.f32 %v137_v16 }
  0xa3   :  { %v138_v17 = vpop.f32.mrf.mxu0 }
  0xa4   :  { %v139_v18 = vadd.f32 %v436_v15, %v138_v17  ;;  %v440_v19 = vpop.eup %439 }
  0xa6   :  { %441 = vtanh.f32 %v139_v18 }
  0xac   :  { %v442_v20 = vpop.eup %441 }
  0xad   :  { %v143_v21 = vpack.c.bf16 %v442_v20, %v440_v19 }
  0xaf   :  { %218 = vmatmul.bf16.vlgmr.msra.gmra.mxu1 %v143_v21 }
 0x12c   :  { %v219_v27 = vpop.f32.mrf.mxu1 }
 0x12d   :  { %v220_v29 = vadd.f32 %v437_v28, %v219_v27 }
 0x12f   :  { %443 = vtanh.f32 %v220_v29 }
 0x134   :  { %v221_v30 = vpop.f32.mrf.mxu1 }
 0x135   :  { %v222_v31 = vadd.f32 %v437_v28, %v221_v30  ;;  %v444_v32 = vpop.eup %443 }
 0x137   :  { %445 = vtanh.f32 %v222_v31 }
 0x13d   :  { %v446_v33 = vpop.eup %445 }
 0x13e   :  { %v226_v34 = vpack.c.bf16 %v446_v33, %v444_v32 }
 0x140   :  { %301 = vmatmul.bf16.vlgmr.msra.gmra.mxu2 %v226_v34 }
 0x1c3   :  { %v302_v36 = vpop.f32.mrf.mxu2 }
 0x1c4   :  { %v303_v37 = vadd.f32 %v438_v35, %v302_v36 }
 0x1c6   :  { %307 = vst [vmem:[#allocation11] sm:$0xff] %v303_v37 }
 0x1cb   :  { %v304_v38 = vpop.f32.mrf.mxu2 }
 0x1cc   :  { %v305_v39 = vadd.f32 %v438_v35, %v304_v38 }
 0x1ce   :  { %308 = vst [vmem:[#allocation11 + $0x8] sm:$0xff] %v305_v39 }
 0x1cf   :  { %321 = dma.vmem_to_hbm [thread:$0]  %s314_s4, 256, %s316_s19, [#allocation4], %s607_s20, %s607_s20, %s608_s21  }
 0x1d0   :  { %597 = dma.done.wait [#allocation4], 256  }
 0x1d1   :  { %598 = vsyncadd [#allocation4], 4294967040 }
 0x1d2   :  { %326 = vsyncpa [#allocation3], 1 }
 0x1d3   :  { %327 = vsyncpa [#allocation6], 1 }
 0x1d4   :  { %328 = vsyncpa [#allocation9], 1 }
 0x1d5   :  { %329 = vsyncpa [#allocation4], 1 }

</bundles_post_ra>
